<compile_context>
chip_gen: v7x
topology: tpu7x:2x2x1
jax: 0.10.0
libtpu: 0.0.40
codegen_flags: <defaults>
</compile_context>

<pallas_src>
import functools

import jax
import jax.numpy as jnp
from jax.experimental import pallas as pl
from jax.experimental.pallas import tpu as pltpu


def _bahdanau_kernel(values_ref, h2_ref, w1_ref, v_ref, bv_ref,
                     ctx_ref, attn_ref):
    Bt, S, _ = attn_ref.shape           # (Bt, S, 1)
    F = values_ref.shape[-1]
    H = w1_ref.shape[-1]

    vals = values_ref[...]                                            # (Bt*S, F)

    # One packed MXU matmul for the whole block of batches.
    h1 = jnp.dot(vals, w1_ref[...],
                 preferred_element_type=jnp.float32)                  # (Bt*S, H) f32

    # Add the precomputed W2(hidden) + b1 + b2 bias per batch (sublane broadcast).
    h = h1.reshape(Bt, S, H) + h2_ref[...]                            # (Bt,S,H)
    e = jnp.tanh(h)                                                   # EUP, f32

    # num_task == 1 score: VPU multiply + lane (XLU) reduction, no MXU.
    score = jnp.sum(e * v_ref[...], axis=2, keepdims=True) + bv_ref[...]   # (Bt,S,1)

    # Numerically stable softmax over the sequence axis (dim=1 of (B,S,T)).
    m = jnp.max(score, axis=1, keepdims=True)                         # (Bt,1,1)
    p = jnp.exp(score - m)
    attn = p / jnp.sum(p, axis=1, keepdims=True)                      # (Bt,S,1)
    attn_ref[...] = attn.astype(attn_ref.dtype)

    # context[b, 0, f] = sum_s attn[b, s] * values[b, s, f]
    # Broadcast multiply (VPU) + sublane reduction (XLU); avoids the M=1 MXU
    # matmul and the explicit attn transpose of the previous version.
    weighted = vals.astype(jnp.float32) * attn.reshape(Bt * S, 1)     # (Bt*S, F)
    ctx = jnp.sum(weighted.reshape(Bt, S, F), axis=1, keepdims=True)  # (Bt,1,F)
    ctx_ref[...] = ctx.astype(ctx_ref.dtype)


def _pick_batch_tile(B, S):
    """Batches per grid step.

    Packs ~256 rows (v6e/v7x MXU alignment; also a multiple of v5e's 128) into
    the MXU M dimension when the per-batch row count is sublane-aligned
    (S % 8 == 0, so the in-kernel (Bt*S, .) <-> (Bt, S, .) reshapes are free).
    For large B the resulting grid has >= 2 parallel steps, which also feeds
    both TensorCores on v7x.
    """
    if S % 8 != 0:
        return 1
    bt = max(1, min(B, max(1, 256 // S)))
    while B % bt:                       # keep the grid exact
        bt -= 1
    return bt


@functools.partial(jax.jit, static_argnames=("mxu_dtype",))
def bahdanau_attention(hidden_states, values, params, *, mxu_dtype=jnp.float32):
    """
    hidden_states : (B, F) float32
    values        : (B, S, F) float32
    params        : PyTorch-convention weights:
                    w1 (H, F), b1 (H,), w2 (H, F), b2 (H,), v (T, H), bv (T,)
    mxu_dtype     : dtype for the MXU operands (values, W1^T); f32 accumulation.
    returns (context_vector (B, T, F), attention_weights (B, S, T))
    """
    B, S, F = values.shape
    H = params["w1"].shape[0]
    T = params["v"].shape[0]
    if T != 1:
        # TODO(synk): num_task > 1 would need the (S,H)@(H,T) MXU score/context
        # path; this kernel specialises the module default num_task == 1.
        raise NotImplementedError("kernel specialises num_task == 1")

    # Precompute the hidden projection for the whole batch with one XLA matmul
    # and fold both biases into it:  h2 = hidden @ W2^T + b2 + b1   -> (B,1,H)
    hproj = hidden_states @ params["w2"].T + params["b2"] + params["b1"]
    hproj = hproj.reshape(B, 1, H).astype(jnp.float32)

    values_flat = values.reshape(B * S, F).astype(mxu_dtype)          # (B*S, F)
    w1_t = params["w1"].T.astype(mxu_dtype)                           # (F, H)
    v_row = params["v"].reshape(1, 1, H).astype(jnp.float32)          # (1,1,H)
    bv = params["bv"].reshape(1, 1, 1).astype(jnp.float32)            # (1,1,1)

    Bt = _pick_batch_tile(B, S)
    grid = (B // Bt,)

    ctx, attn = pl.pallas_call(
        _bahdanau_kernel,
        out_shape=(
            jax.ShapeDtypeStruct((B, 1, F), jnp.float32),   # context (B, T, F)
            jax.ShapeDtypeStruct((B, S, 1), jnp.float32),   # attention (B, S, T)
        ),
        grid_spec=pltpu.PrefetchScalarGridSpec(
            num_scalar_prefetch=0,
            grid=grid,
            in_specs=[
                pl.BlockSpec((Bt * S, F), lambda i: (i, 0)),     # packed values
                pl.BlockSpec((Bt, 1, H), lambda i: (i, 0, 0)),   # W2(hidden)+b1+b2
                pl.BlockSpec((F, H), lambda i: (0, 0)),          # W1^T (resident)
                pl.BlockSpec((1, 1, H), lambda i: (0, 0, 0)),    # V weight row
                pl.BlockSpec((1, 1, 1), lambda i: (0, 0, 0)),    # V bias
            ],
            out_specs=[
                pl.BlockSpec((Bt, 1, F), lambda i: (i, 0, 0)),   # context
                pl.BlockSpec((Bt, S, 1), lambda i: (i, 0, 0)),   # attention weights
            ],
        ),
        compiler_params=pltpu.CompilerParams(
            dimension_semantics=("parallel",)),
    )(values_flat, hproj, w1_t, v_row, bv)

    return ctx, attn


def _reference(hidden_states, values, params):
    # Plain-JAX mirror of the PyTorch forward, for verification.
    hwt = hidden_states[:, None, :]                                  # (B,1,F)
    h1 = values @ params["w1"].T + params["b1"]                      # (B,S,H)
    h2 = hwt @ params["w2"].T + params["b2"]                         # (B,1,H)
    score = jnp.tanh(h1 + h2) @ params["v"].T + params["bv"]         # (B,S,T)
    attn = jax.nn.softmax(score, axis=1)                             # (B,S,T)
    ctx = jnp.swapaxes(jnp.swapaxes(values, 1, 2) @ attn, 1, 2)      # (B,T,F)
    return ctx, attn


if __name__ == "__main__":
    key = jax.random.PRNGKey(0)
    B, S, F, H, T = 2, 8, 32, 32, 1   # batch, seq_len, in_features, hidden_units, num_task

    keys = jax.random.split(key, 8)
    params = {
        "w1": jax.random.normal(keys[0], (H, F), jnp.float32) * 0.1,
        "b1": jax.random.normal(keys[1], (H,), jnp.float32) * 0.1,
        "w2": jax.random.normal(keys[2], (H, F), jnp.float32) * 0.1,
        "b2": jax.random.normal(keys[3], (H,), jnp.float32) * 0.1,
        "v":  jax.random.normal(keys[4], (T, H), jnp.float32) * 0.1,
        "bv": jax.random.normal(keys[5], (T,), jnp.float32) * 0.1,
    }
    hidden_states = jax.random.normal(keys[6], (B, F), jnp.float32)
    values = jax.random.normal(keys[7], (B, S, F), jnp.float32)

    ctx_ref, attn_ref = _reference(hidden_states, values, params)

    # f32 MXU path: exact check against the reference.
    ctx, attn = bahdanau_attention(hidden_states, values, params)
    jax.block_until_ready((ctx, attn))
    assert ctx.shape == (B, T, F) and attn.shape == (B, S, T)
    assert jnp.allclose(ctx, ctx_ref, atol=1e-5, rtol=1e-5)
    assert jnp.allclose(attn, attn_ref, atol=1e-5, rtol=1e-5)

    # bf16 MXU operands (halves HBM traffic for values, 2x MXU throughput);
    # f32 accumulation, so only a loose-tolerance check is meaningful.
    ctx_bf, attn_bf = bahdanau_attention(hidden_states, values, params,
                                         mxu_dtype=jnp.bfloat16)
    jax.block_until_ready((ctx_bf, attn_bf))
    assert jnp.allclose(ctx_bf, ctx_ref, atol=5e-2, rtol=5e-2)
    assert jnp.allclose(attn_bf, attn_ref, atol=5e-2, rtol=5e-2)

    print("KERNEL_OK")
</pallas_src>

<mosaic_0001>
module attributes {stable_mosaic.version = 11 : i64} {
  func.func @_bahdanau_kernel(%arg0: i32, %arg1: memref<16x32xf32, #tpu.memory_space<vmem>>, %arg2: memref<2x1x32xf32, #tpu.memory_space<vmem>>, %arg3: memref<32x32xf32, #tpu.memory_space<vmem>>, %arg4: memref<1x1x32xf32, #tpu.memory_space<vmem>>, %arg5: memref<1x1x1xf32, #tpu.memory_space<vmem>>, %arg6: memref<2x1x32xf32, #tpu.memory_space<vmem>>, %arg7: memref<2x8x1xf32, #tpu.memory_space<vmem>>) attributes {dimension_semantics = [#tpu.dimension_semantics<parallel>], iteration_bounds = array<i64: 1>, scalar_prefetch = 0 : i64, scratch_operands = 0 : i64, tpu.core_type = #tpu.core_type<tc>, window_params = [{transform_indices = @transform_0, window_bounds = array<i64: 16, 32>}, {transform_indices = @transform_1, window_bounds = array<i64: 2, 1, 32>}, {pipeline_mode = #tpu.pipeline_mode<synchronous>, transform_indices = @transform_2, window_bounds = array<i64: 32, 32>}, {pipeline_mode = #tpu.pipeline_mode<synchronous>, transform_indices = @transform_3, window_bounds = array<i64: 1, 1, 32>}, {pipeline_mode = #tpu.pipeline_mode<synchronous>, transform_indices = @transform_4, window_bounds = array<i64: 1, 1, 1>}, {transform_indices = @transform_5, window_bounds = array<i64: 2, 1, 32>}, {transform_indices = @transform_6, window_bounds = array<i64: 2, 8, 1>}]} {
    %c0 = arith.constant 0 : index
    %c0_0 = arith.constant 0 : index
    %0 = vector.load %arg1[%c0, %c0_0] : memref<16x32xf32, #tpu.memory_space<vmem>>, vector<16x32xf32>
    %c0_1 = arith.constant 0 : index
    %c0_2 = arith.constant 0 : index
    %1 = vector.load %arg3[%c0_1, %c0_2] : memref<32x32xf32, #tpu.memory_space<vmem>>, vector<32x32xf32>
    %cst = arith.constant dense<0.000000e+00> : vector<16x32xf32>
    %2 = tpu.matmul %0, %1, %cst {dimension_numbers = #tpu.dot_dimension_numbers<[1], [0], [0], [1], [0, 0, 1, 1], [], []>} : vector<16x32xf32>, vector<32x32xf32>, vector<16x32xf32> -> vector<16x32xf32>
    %3 = vector.shape_cast %2 : vector<16x32xf32> to vector<2x8x32xf32>
    %c0_3 = arith.constant 0 : index
    %c0_4 = arith.constant 0 : index
    %c0_5 = arith.constant 0 : index
    %4 = vector.load %arg2[%c0_3, %c0_4, %c0_5] : memref<2x1x32xf32, #tpu.memory_space<vmem>>, vector<2x1x32xf32>
    %5 = vector.broadcast %4 : vector<2x1x32xf32> to vector<2x8x32xf32>
    %6 = arith.addf %3, %5 : vector<2x8x32xf32>
    %7 = math.tanh %6 : vector<2x8x32xf32>
    %c0_6 = arith.constant 0 : index
    %c0_7 = arith.constant 0 : index
    %c0_8 = arith.constant 0 : index
    %8 = vector.load %arg4[%c0_6, %c0_7, %c0_8] : memref<1x1x32xf32, #tpu.memory_space<vmem>>, vector<1x1x32xf32>
    %9 = vector.broadcast %8 : vector<1x1x32xf32> to vector<2x8x32xf32>
    %10 = arith.mulf %7, %9 : vector<2x8x32xf32>
    %cst_9 = arith.constant dense<0.000000e+00> : vector<2x8xf32>
    %11 = vector.multi_reduction <add>, %10, %cst_9 [2] : vector<2x8x32xf32> to vector<2x8xf32>
    %12 = vector.shape_cast %11 : vector<2x8xf32> to vector<2x8x1xf32>
    %c0_10 = arith.constant 0 : index
    %c0_11 = arith.constant 0 : index
    %c0_12 = arith.constant 0 : index
    %13 = vector.load %arg5[%c0_10, %c0_11, %c0_12] : memref<1x1x1xf32, #tpu.memory_space<vmem>>, vector<1x1x1xf32>
    %14 = vector.broadcast %13 : vector<1x1x1xf32> to vector<2x8x1xf32>
    %15 = arith.addf %12, %14 : vector<2x8x1xf32>
    %cst_13 = arith.constant dense<0xFF800000> : vector<2x1xf32>
    %16 = vector.multi_reduction <maximumf>, %15, %cst_13 [1] : vector<2x8x1xf32> to vector<2x1xf32>
    %17 = vector.shape_cast %16 : vector<2x1xf32> to vector<2x1x1xf32>
    %18 = vector.broadcast %17 : vector<2x1x1xf32> to vector<2x8x1xf32>
    %19 = arith.subf %15, %18 : vector<2x8x1xf32>
    %20 = math.exp %19 : vector<2x8x1xf32>
    %cst_14 = arith.constant dense<0.000000e+00> : vector<2x1xf32>
    %21 = vector.multi_reduction <add>, %20, %cst_14 [1] : vector<2x8x1xf32> to vector<2x1xf32>
    %22 = vector.shape_cast %21 : vector<2x1xf32> to vector<2x1x1xf32>
    %23 = vector.broadcast %22 : vector<2x1x1xf32> to vector<2x8x1xf32>
    %24 = arith.divf %20, %23 : vector<2x8x1xf32>
    %c0_15 = arith.constant 0 : index
    %c0_16 = arith.constant 0 : index
    %c0_17 = arith.constant 0 : index
    %25 = vector.load %arg7[%c0_15, %c0_16, %c0_17] : memref<2x8x1xf32, #tpu.memory_space<vmem>>, vector<2x8x1xf32>
    tpu.vector_store %arg7[%c0_15, %c0_16, %c0_17], %24 {strides = array<i32>} : memref<2x8x1xf32, #tpu.memory_space<vmem>>, vector<2x8x1xf32>,
    %26 = vector.shape_cast %24 : vector<2x8x1xf32> to vector<16x1xf32>
    %27 = vector.broadcast %26 : vector<16x1xf32> to vector<16x32xf32>
    %28 = arith.mulf %0, %27 : vector<16x32xf32>
    %29 = vector.shape_cast %28 : vector<16x32xf32> to vector<2x8x32xf32>
    %cst_18 = arith.constant dense<0.000000e+00> : vector<2x32xf32>
    %30 = vector.multi_reduction <add>, %29, %cst_18 [1] : vector<2x8x32xf32> to vector<2x32xf32>
    %31 = vector.shape_cast %30 : vector<2x32xf32> to vector<2x1x32xf32>
    %c0_19 = arith.constant 0 : index
    %c0_20 = arith.constant 0 : index
    %c0_21 = arith.constant 0 : index
    %32 = vector.load %arg6[%c0_19, %c0_20, %c0_21] : memref<2x1x32xf32, #tpu.memory_space<vmem>>, vector<2x1x32xf32>
    tpu.vector_store %arg6[%c0_19, %c0_20, %c0_21], %31 {strides = array<i32>} : memref<2x1x32xf32, #tpu.memory_space<vmem>>, vector<2x1x32xf32>,
    return
  }
  func.func @transform_0(%arg0: i32) -> (i32, i32) {
    %c0_i32 = arith.constant 0 : i32
    %c0_i32_0 = arith.constant 0 : i32
    return %arg0, %c0_i32 : i32, i32
  }
  func.func @transform_1(%arg0: i32) -> (i32, i32, i32) {
    %c0_i32 = arith.constant 0 : i32
    %c0_i32_0 = arith.constant 0 : i32
    %c0_i32_1 = arith.constant 0 : i32
    return %arg0, %c0_i32, %c0_i32_0 : i32, i32, i32
  }
  func.func @transform_2(%arg0: i32) -> (i32, i32) {
    %c0_i32 = arith.constant 0 : i32
    %c0_i32_0 = arith.constant 0 : i32
    %c0_i32_1 = arith.constant 0 : i32
    return %c0_i32, %c0_i32_0 : i32, i32
  }
  func.func @transform_3(%arg0: i32) -> (i32, i32, i32) {
    %c0_i32 = arith.constant 0 : i32
    %c0_i32_0 = arith.constant 0 : i32
    %c0_i32_1 = arith.constant 0 : i32
    %c0_i32_2 = arith.constant 0 : i32
    return %c0_i32, %c0_i32_0, %c0_i32_1 : i32, i32, i32
  }
  func.func @transform_4(%arg0: i32) -> (i32, i32, i32) {
    %c0_i32 = arith.constant 0 : i32
    %c0_i32_0 = arith.constant 0 : i32
    %c0_i32_1 = arith.constant 0 : i32
    %c0_i32_2 = arith.constant 0 : i32
    return %c0_i32, %c0_i32_0, %c0_i32_1 : i32, i32, i32
  }
  func.func @transform_5(%arg0: i32) -> (i32, i32, i32) {
    %c0_i32 = arith.constant 0 : i32
    %c0_i32_0 = arith.constant 0 : i32
    %c0_i32_1 = arith.constant 0 : i32
    return %arg0, %c0_i32, %c0_i32_0 : i32, i32, i32
  }
  func.func @transform_6(%arg0: i32) -> (i32, i32, i32) {
    %c0_i32 = arith.constant 0 : i32
    %c0_i32_0 = arith.constant 0 : i32
    %c0_i32_1 = arith.constant 0 : i32
    return %arg0, %c0_i32, %c0_i32_0 : i32, i32, i32
  }
}

</mosaic_0001>

<bundles_post_ra>
// kernel: bahdanau_attention.1
= control target key start
LH: loop header
LB: loop body
LE: loop exit
PB: predicated region body
PF: predicated region fallthrough
CT: control target
= control target key end

     0   :  { %s425_s0 = inlined_call_operand.vmem [shape: f32[16,32], index: 0, kind: input, shape index: {}]   ;;  %s426_s1 = inlined_call_operand.vmem [shape: f32[2,1,32], index: 1, kind: input, shape index: {}]   ;;  %s427_s2 = inlined_call_operand.vmem [shape: f32[32,32], index: 2, kind: input, shape index: {}]   ;;  %s428_s3 = inlined_call_operand.vmem [shape: f32[1,1,32], index: 3, kind: input, shape index: {}]   ;;  %s429_s4 = inlined_call_operand.<no memory space> [shape: f32[1,1,1], index: 4, kind: input, shape index: {}]   ;;  %s430_s5 = inlined_call_operand.hbm [shape: f32[2,1,32], index: 5, kind: output, shape index: {0}]   ;;  %s431_s6 = inlined_call_operand.vmem [shape: f32[2,8,1], index: 6, kind: output, shape index: {1}]  }
   0x1   :  { %v12_v0 = vstv %s429_s4 }
   0x2   :  { %13 = vst [vmem:[#allocation2] sm:$0x1] %v12_v0 }
   0x3   :  { %v27_v1 = vld [vmem:[%s427_s2] sm:$0xff]  ;;  %v28_v2 = vld [vmem:[%s427_s2 + $0x8] sm:$0xff]  ;;  %v29_v3 = vld [vmem:[%s427_s2 + $0x10] sm:$0xff]  ;;  %vm31_vm0 = vcmask 261120  }
   0x4   :  { %v268_v4 = vpack.c.bf16 %v28_v2, %v27_v1  ;;  %v30_v5 = vld [vmem:[%s427_s2 + $0x18] sm:$0xff]  ;;  %v375_v6 = vld [vmem:[%s425_s0] sm:$0xff] }
   0x5   :  { %v272_v7 = vpack.c.bf16 %v30_v5, %v29_v3  ;;  %265 = vmatprep.mubr.msk.f32.mxu0 %vm31_vm0, %v375_v6 }
   0x6   :  { %14 = vsyncpa [#allocation4], 0  ;;  %269 = vmatprep.subr.bf16.mxu0 %v268_v4  ;;  %v382_v8 = vld [vmem:[%s425_s0 + $0x8] sm:$0xff]  ;;  %v248_v9 = vld [vmem:[%s426_s1 + $0x1] ss:$0 sm:$0xff]  ;;  %v318_v22 = vmov 0  }
   0x7   :  { %271 = vmatpush3.bf16.msra.mxu0 %v268_v4  ;;  %v247_v10 = vld [vmem:[%s426_s1] ss:$0 sm:$0xff]  ;;  %280 = vset.pattern.permute.xlu1 %v318_v22  ;;  %vm155_vm1 = vcmask 7168   ;;  %vm222_vm2 = vcmask 253952  }
   0x8   :  { %273 = vmatprep.subr.bf16.mxu0 %v272_v7  ;;  %v249_v15 = vld [vmem:[%s428_s3] ss:$0 sm:$0xff]  ;;  %281 = vset.pattern.permute.xlu0 %v318_v22 }
   0x9   :  { %v250_v23 = vld [vmem:[#allocation2] ss:$0 sm:$0xff] }
   0xb   :  { %275 = vmatpush3.bf16.msra.mxu0 %v272_v7 }
   0xe   :  { %266 = vmatmul.mubr.msk.f32.vlgmr.msra.gmra.mrb[0].mxu0 %vm31_vm0, %v382_v8 }
  0xe1   :  { %v267_v11 = vpop.f32.mrb[0].mxu0 }
  0xe2   :  { %v128_v12 = vadd.f32 %v267_v11, %v248_v9  ;;  %v104_v13 = vpop.f32.mrb[1].mxu0 }
  0xe3   :  { %v127_v14 = vadd.f32 %v247_v10, %v104_v13 }
  0xe4   :  { %282 = vtanh.f32 %v128_v12 }
  0xe5   :  { %284 = vtanh.f32 %v127_v14 }
  0xee   :  { %v283_v16 = vpop.eup %282 }
  0xef   :  { %v285_v17 = vpop.eup %284  ;;  %v139_v20 = vmul.f32 %v283_v16, %v249_v15 }
  0xf0   :  { %v138_v18 = vmul.f32 %v285_v17, %v249_v15 }
  0xf1   :  { %v143_v21 = vsel %vm31_vm0, %v139_v20, 0.0 }
  0xf2   :  { %v140_v19 = vsel %vm31_vm0, %v138_v18, 0.0 }
  0xf3   :  { %141 = vadd.xlane.f32.xlu0 %v140_v19 }
  0xf7   :  { %144 = vadd.xlane.f32.xlu0 %v143_v21 }
 0x180   :  { %v142_v24 = vpop.xlane.xlu0 %141 }
 0x181   :  { %v153_v25 = vadd.f32 %v250_v23, %v142_v24 }
 0x183   :  { %v156_v26 = vsel %vm155_vm1, %v153_v25, -inf }
 0x184   :  { %v157_v27 = vrot.slane %v156_v26, 4  ;;  %v145_v28 = vpop.xlane.xlu0 %144 }
 0x185   :  { %v154_v29 = vadd.f32 %v250_v23, %v145_v28 }
 0x186   :  { %v158_v30 = vmax.f32 %v156_v26, %v157_v27 }
 0x187   :  { %v163_v31 = vsel %vm155_vm1, %v154_v29, -inf }
 0x188   :  { %v159_v32 = vrot.slane %v158_v30, 2  ;;  %v164_v33 = vrot.slane %v163_v31, 4 }
 0x18a   :  { %v160_v34 = vmax.f32 %v158_v30, %v159_v32  ;;  %v165_v35 = vmax.f32 %v163_v31, %v164_v33 }
 0x18c   :  { %v161_v36 = vrot.slane %v160_v34, 1  ;;  %v166_v37 = vrot.slane %v165_v35, 2 }
 0x18e   :  { %v162_v38 = vmax.f32 %v160_v34, %v161_v36  ;;  %v167_v39 = vmax.f32 %v165_v35, %v166_v37 }
 0x190   :  { %v170_v40 = vsub.f32 %v153_v25, %v162_v38  ;;  %v168_v41 = vrot.slane %v167_v39, 1 }
 0x192   :  { %v172_v42 = vmul.f32 1.442695, %v170_v40  ;;  %v169_v43 = vmax.f32 %v167_v39, %v168_v41 }
 0x194   :  { %286 = vpow2.f32 %v172_v42  ;;  %v171_v44 = vsub.f32 %v154_v29, %v169_v43 }
 0x196   :  { %v174_v45 = vmul.f32 1.442695, %v171_v44 }
 0x198   :  { %288 = vpow2.f32 %v174_v45 }
 0x19e   :  { %v287_v46 = vpop.eup %286 }
 0x19f   :  { %v176_v47 = vsel %vm155_vm1, %v287_v46, 0.0 }
 0x1a0   :  { %v177_v48 = vrot.slane %v176_v47, 4 }
 0x1a2   :  { %v289_v49 = vpop.eup %288  ;;  %v178_v50 = vadd.f32 %v177_v48, %v176_v47 }
 0x1a3   :  { %v183_v51 = vsel %vm155_vm1, %v289_v49, 0.0 }
 0x1a4   :  { %v184_v52 = vrot.slane %v183_v51, 4  ;;  %v179_v53 = vrot.slane %v178_v50, 2 }
 0x1a6   :  { %v185_v54 = vadd.f32 %v184_v52, %v183_v51  ;;  %v180_v55 = vadd.f32 %v179_v53, %v178_v50 }
 0x1a8   :  { %v186_v56 = vrot.slane %v185_v54, 2  ;;  %v181_v57 = vrot.slane %v180_v55, 1 }
 0x1aa   :  { %v182_v58 = vadd.f32 %v181_v57, %v180_v55  ;;  %v187_v59 = vadd.f32 %v186_v56, %v185_v54 }
 0x1ac   :  { %290 = vrcp.f32 %v182_v58  ;;  %v188_v60 = vrot.slane %v187_v59, 1 }
 0x1ae   :  { %v189_v61 = vadd.f32 %v188_v60, %v187_v59 }
 0x1b0   :  { %292 = vrcp.f32 %v189_v61 }
 0x1b6   :  { %v291_v62 = vpop.eup %290 }
 0x1b7   :  { %v191_v63 = vmul.f32 %v291_v62, %v287_v46 }
 0x1b9   :  { %198 = vperm.xlu1 %280, %v191_v63   ;;  %194 = vst.msk [vmem:[%s431_s6] sm:$0xff] %vm155_vm1, %v191_v63 }
 0x1ba   :  { %v293_v0 = vpop.eup %292 }
 0x1bb   :  { %v193_v1 = vmul.f32 %v293_v0, %v289_v49 }
 0x1bd   :  { %203 = vperm.xlu1 %280, %v193_v1   ;;  %195 = vst.msk [vmem:[%s431_s6 + $0x8] sm:$0xff] %vm155_vm1, %v193_v1  ;;  %s319_s6 = smov [#allocation3]  }
 0x1be   :  { %s230_s16 = sshll.u32 %s319_s6, 4  ;;  %s231_s16 = int_to_ptr.vmem [resolvable:$true] %s230_s16 }
 0x1bf   :  { %s294_s17 = scalar_lea.vmem %s231_s16, 32  ;;  %p299_p1 = scmp.lt.s32.totalorder %s231_s16, %s231_s16 }
 0x1c0   :  { %p295_p0 = scmp.ne.s32.totalorder %s231_s16, %s294_s17  ;;  %p300_p2 = scmp.lt.s32.totalorder %s294_s17, %s294_s17 }
 0x1c2   :  { %p301_p3 = por %p300_p2, %p299_p1 }
 0x1c4   :  { %p302_p4 = pnand %p301_p3, %p295_p0 }
 0x238   :  { %v199_v2 = vpop.permute.xlu1 %198 }
 0x239   :  { %v206_v3 = vmul.f32 %v199_v2, %v375_v6 }
 0x23b   :  { %v208_v4 = vsel %vm31_vm0, %v206_v3, 0.0 }
 0x23c   :  { %v209_v5 = vrot.slane %v208_v4, 4  ;;  %v204_v7 = vpop.permute.xlu1 %203 }
 0x23d   :  { %v207_v9 = vmul.f32 %v204_v7, %v382_v8 }
 0x23e   :  { %v210_v10 = vadd.f32 %v209_v5, %v208_v4 }
 0x23f   :  { %v215_v11 = vsel %vm31_vm0, %v207_v9, 0.0 }
 0x240   :  { %v211_v12 = vrot.slane %v210_v10, 2  ;;  %v216_v13 = vrot.slane %v215_v11, 4 }
 0x242   :  { %v212_v14 = vadd.f32 %v211_v12, %v210_v10  ;;  %v217_v15 = vadd.f32 %v216_v13, %v215_v11 }
 0x244   :  { %v213_v16 = vrot.slane %v212_v14, 1  ;;  %v218_v17 = vrot.slane %v217_v15, 2 }
 0x246   :  { %v214_v18 = vadd.f32 %v213_v16, %v212_v14  ;;  %v219_v19 = vadd.f32 %v218_v17, %v217_v15 }
 0x248   :  { %v220_v6 = vrot.slane %v219_v19, 1  ;;  %223 = vst.msk [vmem:[#allocation3] sm:$0x1] %vm222_vm2, %v214_v18 }
 0x24a   :  { %v221_v20 = vadd.f32 %v220_v6, %v219_v19 }
 0x24c   :  { %224 = vst.msk [vmem:[#allocation3 + $0x1] sm:$0x1] %vm222_vm2, %v221_v20 }
 0x24d   :  { %305 = shalt.err (!%p302_p4)
}
 0x24e   :  { %s306_s20 = scalar_lea.hbm %s430_s5, 32 }
 0x24f   :  { %p307_p5 = scmp.ne.s32.totalorder %s430_s5, %s306_s20  ;;  %p310_p6 = scmp.lt.u32.totalorder %s306_s20, %s430_s5 }
 0x251   :  { %p312_p7 = pnand %p310_p6, %p307_p5 }
 0x253   :  { %315 = shalt.err (!%p312_p7)
}
 0x254   :  { %s320_s25 = smov 16   ;;  %s321_s26 = smov 1  }
 0x255   :  { %236 = dma.vmem_to_hbm [thread:$0]  %s231_s16, 32, %s430_s5, [#allocation4], %s320_s25, %s320_s25, %s321_s26  }
 0x256   :  { %316 = dma.done.wait [#allocation4], 32  }
 0x257   :  { %317 = vsyncadd [#allocation4], 4294967264 }
 0x258   :  { %244 = vsyncpa [#allocation4], 1 }

</bundles_post_ra>
